<compile_context>
chip_gen: v6e
topology: v6e:2x2x1
jax: 0.10.0
libtpu: 0.0.40
codegen_flags: <defaults>
</compile_context>

<pallas_src>
import math
import jax
import jax.numpy as jnp
from jax import lax
from jax.experimental import pallas as pl
from jax.experimental.pallas import tpu as pltpu


_INV_SQRT2 = 1.0 / math.sqrt(2.0)


def _gelu_exact(x):
    # nn.GELU() default is the exact erf formulation.
    return 0.5 * x * (1.0 + lax.erf(x * _INV_SQRT2))


def _round_up(n, m):
    return ((n + m - 1) // m) * m


def _vmem_capacity_bytes():
    """Physical VMEM capacity of the current chip (fallback: 64 MiB, v7x)."""
    try:
        return int(pltpu.get_tpu_info().vmem_capacity_bytes)
    except Exception:
        return 64 * 1024 * 1024


def _th_candidates(H):
    """Hidden-chunk sizes: H itself, plus lane-aligned divisors of H."""
    cands = {H}
    d = 128
    while d < H:
        if H % d == 0:
            cands.add(d)
        d += 128
    return sorted(cands, reverse=True)


def _vmem_estimate(tm, th, D, x_bytes, w_bytes, multi_chunk):
    """Rough double-buffered VMEM footprint of one grid step."""
    est = 0
    est += 2 * tm * D * x_bytes          # x row tile (double-buffered)
    est += 2 * tm * D * x_bytes          # output tile (double-buffered)
    est += 2 * D * th * w_bytes          # w1 chunk  (double-buffered)
    est += 2 * th * D * w_bytes          # w2 chunk  (double-buffered)
    est += 2 * (th + D) * 4              # biases
    est += tm * th * 4                   # f32 (tm, th) GELU intermediate
    if multi_chunk:
        est += tm * D * 4                # resident f32 accumulator
    return est


def _auto_tiles(N, D, H, x_dtype, w_dtype, vmem_budget, tm_req=None, th_req=None):
    """Pick (tm, th) — largest row tile, then largest hidden chunk, that fit."""
    x_bytes = jnp.dtype(x_dtype).itemsize
    w_bytes = jnp.dtype(w_dtype).itemsize
    align = 16 if x_bytes < 4 else 8     # bf16 packs 16 rows per sublane group

    n_pad_full = _round_up(N, align)
    # Keep at least 2 row tiles when possible (v7x megacore sharding).
    tm_cap = n_pad_full if N <= align else _round_up((N + 1) // 2, align)

    if tm_req is not None:
        tm_list = [max(align, min(_round_up(tm_req, align), tm_cap))]
    else:
        tm_list = [t for t in (1024, 768, 512, 384, 256, 128, 64, 32, 16, 8)
                   if t % align == 0 and t <= tm_cap]
        if not tm_list or tm_list[0] != tm_cap:
            tm_list = [tm_cap] + tm_list

    th_all = _th_candidates(H)
    if th_req is not None:
        th_list = [t for t in th_all if t <= th_req] or [th_all[-1]]
    else:
        th_list = th_all

    for tm in tm_list:
        for th in th_list:
            if _vmem_estimate(tm, th, D, x_bytes, w_bytes, th < H) <= vmem_budget:
                return tm, th
    return tm_list[-1], th_list[-1]


# ----------------------------------------------------------------------------
# Kernels
# ----------------------------------------------------------------------------

def _mlp_kernel_fullh(x_ref, w1_ref, b1_ref, w2_ref, b2_ref, o_ref):
    """Single hidden chunk: both weights resident per row tile, no scratch."""
    h = jnp.dot(x_ref[...], w1_ref[...], preferred_element_type=jnp.float32)
    h = h + b1_ref[...].astype(jnp.float32)
    h = _gelu_exact(h)
    out = jnp.dot(h.astype(w2_ref.dtype), w2_ref[...],
                  preferred_element_type=jnp.float32)
    out = out + b2_ref[...].astype(jnp.float32)
    o_ref[...] = out.astype(o_ref.dtype)


def _mlp_kernel_chunked(x_ref, w1_ref, b1_ref, w2_ref, b2_ref, o_ref, acc_ref):
    """Hidden dimension tiled on an 'arbitrary' axis with f32 accumulator."""
    j = pl.program_id(1)

    @pl.when(j == 0)
    def _():
        # Fold the fc2 bias into the accumulator init (single broadcast).
        acc_ref[...] = jnp.broadcast_to(
            b2_ref[...].astype(jnp.float32), acc_ref.shape)

    h = jnp.dot(x_ref[...], w1_ref[...], preferred_element_type=jnp.float32)
    h = h + b1_ref[...].astype(jnp.float32)
    h = _gelu_exact(h)
    acc_ref[...] += jnp.dot(h.astype(w2_ref.dtype), w2_ref[...],
                            preferred_element_type=jnp.float32)

    @pl.when(j == pl.num_programs(1) - 1)
    def _():
        o_ref[...] = acc_ref[...].astype(o_ref.dtype)


# ----------------------------------------------------------------------------
# Wrapper
# ----------------------------------------------------------------------------

def mlp_pallas(x, w1, b1, w2, b2, *, tm=None, th=None, vmem_fraction=0.8):
    """x: (..., D). w1: (D, H), b1: (H,), w2: (H, D), b2: (D,).

    Weights are stored pre-transposed as (in, out) so the kernel does plain
    row-major matmuls on the MXU. Pass bf16 weights/activations for full MXU
    rate; accumulation is f32 either way.
    """
    orig_shape = x.shape
    D = orig_shape[-1]
    H = w1.shape[1]
    x2 = x.reshape(-1, D)
    N = x2.shape[0]

    vmem_limit = int(_vmem_capacity_bytes() * vmem_fraction)
    tm, th = _auto_tiles(N, D, H, x2.dtype, w1.dtype, vmem_limit, tm, th)

    n_pad = _round_up(N, tm)
    if n_pad != N:
        x2 = jnp.pad(x2, ((0, n_pad - N), (0, 0)))

    b1_2d = b1.reshape(1, H)
    b2_2d = b2.reshape(1, D)
    n_row_tiles = n_pad // tm

    if th == H:
        # Fast path: full hidden dim per step, output written directly.
        out = pl.pallas_call(
            _mlp_kernel_fullh,
            out_shape=jax.ShapeDtypeStruct((n_pad, D), x.dtype),
            grid_spec=pltpu.PrefetchScalarGridSpec(
                num_scalar_prefetch=0,
                grid=(n_row_tiles,),
                in_specs=[
                    pl.BlockSpec((tm, D), lambda i: (i, 0)),   # x rows
                    pl.BlockSpec((D, H), lambda i: (0, 0)),    # w1
                    pl.BlockSpec((1, H), lambda i: (0, 0)),    # b1
                    pl.BlockSpec((H, D), lambda i: (0, 0)),    # w2
                    pl.BlockSpec((1, D), lambda i: (0, 0)),    # b2
                ],
                out_specs=pl.BlockSpec((tm, D), lambda i: (i, 0)),
            ),
            compiler_params=pltpu.CompilerParams(
                dimension_semantics=("parallel",),
                vmem_limit_bytes=vmem_limit),
        )(x2, w1, b1_2d, w2, b2_2d)
    else:
        # VMEM-constrained path (e.g. v7x): tile the hidden dim, accumulate.
        out = pl.pallas_call(
            _mlp_kernel_chunked,
            out_shape=jax.ShapeDtypeStruct((n_pad, D), x.dtype),
            grid_spec=pltpu.PrefetchScalarGridSpec(
                num_scalar_prefetch=0,
                grid=(n_row_tiles, H // th),
                in_specs=[
                    pl.BlockSpec((tm, D), lambda i, j: (i, 0)),   # x rows
                    pl.BlockSpec((D, th), lambda i, j: (0, j)),   # w1 chunk
                    pl.BlockSpec((1, th), lambda i, j: (0, j)),   # b1 chunk
                    pl.BlockSpec((th, D), lambda i, j: (j, 0)),   # w2 chunk
                    pl.BlockSpec((1, D), lambda i, j: (0, 0)),    # b2
                ],
                out_specs=pl.BlockSpec((tm, D), lambda i, j: (i, 0)),
                scratch_shapes=[pltpu.VMEM((tm, D), jnp.float32)],
            ),
            compiler_params=pltpu.CompilerParams(
                dimension_semantics=("parallel", "arbitrary"),
                vmem_limit_bytes=vmem_limit),
        )(x2, w1, b1_2d, w2, b2_2d)

    if n_pad != N:
        out = out[:N]
    return out.reshape(orig_shape)


def init_mlp_params(key, embed_dim, mlp_ratio, dtype=jnp.float32):
    """Deterministic init mirroring nn.Linear shapes (weights pre-transposed
    to (in, out) for the kernel). Use dtype=jnp.bfloat16 in production for
    full MXU rate and half the weight-streaming bytes."""
    hidden = int(embed_dim * mlp_ratio)
    k1, k2, k3, k4 = jax.random.split(key, 4)
    lim1 = 1.0 / math.sqrt(embed_dim)
    lim2 = 1.0 / math.sqrt(hidden)
    w1 = jax.random.uniform(k1, (embed_dim, hidden), dtype, -lim1, lim1)
    b1 = jax.random.uniform(k2, (hidden,), dtype, -lim1, lim1)
    w2 = jax.random.uniform(k3, (hidden, embed_dim), dtype, -lim2, lim2)
    b2 = jax.random.uniform(k4, (embed_dim,), dtype, -lim2, lim2)
    return w1, b1, w2, b2


if __name__ == "__main__":
    key = jax.random.PRNGKey(0)
    kx, kp = jax.random.split(key)

    def ref_mlp(x, w1, b1, w2, b2):
        h = x @ w1 + b1
        h = 0.5 * h * (1.0 + lax.erf(h * _INV_SQRT2))
        return h @ w2 + b2

    # Small config matching the module's forward (exercises the full-H path).
    batch, seq, embed_dim, mlp_ratio = 2, 8, 32, 4
    x = jax.random.normal(kx, (batch, seq, embed_dim), jnp.float32)
    w1, b1, w2, b2 = init_mlp_params(kp, embed_dim, mlp_ratio, jnp.float32)
    y = jax.block_until_ready(mlp_pallas(x, w1, b1, w2, b2))
    assert jnp.allclose(y, ref_mlp(x, w1, b1, w2, b2), atol=1e-4, rtol=1e-4), \
        "mismatch vs reference (full-H path)"

    # Second small config forcing the chunked accumulator path (th = H/2).
    embed_dim2, mlp_ratio2 = 128, 4          # H = 512, th forced to 256
    x2 = jax.random.normal(kx, (batch, seq, embed_dim2), jnp.float32)
    p2 = init_mlp_params(kp, embed_dim2, mlp_ratio2, jnp.float32)
    y2 = jax.block_until_ready(mlp_pallas(x2, *p2, th=256))
    assert jnp.allclose(y2, ref_mlp(x2, *p2), atol=1e-4, rtol=1e-4), \
        "mismatch vs reference (chunked path)"

    print("KERNEL_OK")
</pallas_src>

<mosaic_0001>
module attributes {stable_mosaic.version = 11 : i64} {
  func.func @_mlp_kernel_fullh(%arg0: i32, %arg1: memref<8x32xf32, #tpu.memory_space<vmem>>, %arg2: memref<32x128xf32, #tpu.memory_space<vmem>>, %arg3: memref<1x128xf32, #tpu.memory_space<vmem>>, %arg4: memref<128x32xf32, #tpu.memory_space<vmem>>, %arg5: memref<1x32xf32, #tpu.memory_space<vmem>>, %arg6: memref<8x32xf32, #tpu.memory_space<vmem>>) attributes {dimension_semantics = [#tpu.dimension_semantics<parallel>], iteration_bounds = array<i64: 2>, scalar_prefetch = 0 : i64, scratch_operands = 0 : i64, tpu.core_type = #tpu.core_type<tc>, window_params = [{transform_indices = @transform_0, window_bounds = array<i64: 8, 32>}, {pipeline_mode = #tpu.pipeline_mode<synchronous>, transform_indices = @transform_1, window_bounds = array<i64: 32, 128>}, {pipeline_mode = #tpu.pipeline_mode<synchronous>, transform_indices = @transform_2, window_bounds = array<i64: 1, 128>}, {pipeline_mode = #tpu.pipeline_mode<synchronous>, transform_indices = @transform_3, window_bounds = array<i64: 128, 32>}, {pipeline_mode = #tpu.pipeline_mode<synchronous>, transform_indices = @transform_4, window_bounds = array<i64: 1, 32>}, {transform_indices = @transform_5, window_bounds = array<i64: 8, 32>}]} {
    %c0 = arith.constant 0 : index
    %c0_0 = arith.constant 0 : index
    %0 = vector.load %arg1[%c0, %c0_0] : memref<8x32xf32, #tpu.memory_space<vmem>>, vector<8x32xf32>
    %c0_1 = arith.constant 0 : index
    %c0_2 = arith.constant 0 : index
    %1 = vector.load %arg2[%c0_1, %c0_2] : memref<32x128xf32, #tpu.memory_space<vmem>>, vector<32x128xf32>
    %cst = arith.constant dense<0.000000e+00> : vector<8x128xf32>
    %2 = tpu.matmul %0, %1, %cst {dimension_numbers = #tpu.dot_dimension_numbers<[1], [0], [0], [1], [0, 0, 1, 1], [], []>} : vector<8x32xf32>, vector<32x128xf32>, vector<8x128xf32> -> vector<8x128xf32>
    %c0_3 = arith.constant 0 : index
    %c0_4 = arith.constant 0 : index
    %3 = vector.load %arg3[%c0_3, %c0_4] : memref<1x128xf32, #tpu.memory_space<vmem>>, vector<1x128xf32>
    %4 = vector.broadcast %3 : vector<1x128xf32> to vector<8x128xf32>
    %5 = arith.addf %2, %4 : vector<8x128xf32>
    %cst_5 = arith.constant 5.000000e-01 : f32
    %6 = vector.broadcast %cst_5 : f32 to vector<8x128xf32>
    %7 = arith.mulf %6, %5 : vector<8x128xf32>
    %cst_6 = arith.constant 0.707106769 : f32
    %8 = vector.broadcast %cst_6 : f32 to vector<8x128xf32>
    %9 = arith.mulf %5, %8 : vector<8x128xf32>
    %10 = math.erf %9 : vector<8x128xf32>
    %cst_7 = arith.constant 1.000000e+00 : f32
    %11 = vector.broadcast %cst_7 : f32 to vector<8x128xf32>
    %12 = arith.addf %11, %10 : vector<8x128xf32>
    %13 = arith.mulf %7, %12 : vector<8x128xf32>
    %c0_8 = arith.constant 0 : index
    %c0_9 = arith.constant 0 : index
    %14 = vector.load %arg4[%c0_8, %c0_9] : memref<128x32xf32, #tpu.memory_space<vmem>>, vector<128x32xf32>
    %cst_10 = arith.constant dense<0.000000e+00> : vector<8x32xf32>
    %15 = tpu.matmul %13, %14, %cst_10 {dimension_numbers = #tpu.dot_dimension_numbers<[1], [0], [0], [1], [0, 0, 1, 1], [], []>} : vector<8x128xf32>, vector<128x32xf32>, vector<8x32xf32> -> vector<8x32xf32>
    %c0_11 = arith.constant 0 : index
    %c0_12 = arith.constant 0 : index
    %16 = vector.load %arg5[%c0_11, %c0_12] : memref<1x32xf32, #tpu.memory_space<vmem>>, vector<1x32xf32>
    %17 = vector.broadcast %16 : vector<1x32xf32> to vector<8x32xf32>
    %18 = arith.addf %15, %17 : vector<8x32xf32>
    %c0_13 = arith.constant 0 : index
    %c0_14 = arith.constant 0 : index
    %19 = vector.load %arg6[%c0_13, %c0_14] : memref<8x32xf32, #tpu.memory_space<vmem>>, vector<8x32xf32>
    tpu.vector_store %arg6[%c0_13, %c0_14], %18 {strides = array<i32>} : memref<8x32xf32, #tpu.memory_space<vmem>>, vector<8x32xf32>,
    return
  }
  func.func @transform_0(%arg0: i32) -> (i32, i32) {
    %c0_i32 = arith.constant 0 : i32
    %c0_i32_0 = arith.constant 0 : i32
    return %arg0, %c0_i32 : i32, i32
  }
  func.func @transform_1(%arg0: i32) -> (i32, i32) {
    %c0_i32 = arith.constant 0 : i32
    %c0_i32_0 = arith.constant 0 : i32
    %c0_i32_1 = arith.constant 0 : i32
    return %c0_i32, %c0_i32_0 : i32, i32
  }
  func.func @transform_2(%arg0: i32) -> (i32, i32) {
    %c0_i32 = arith.constant 0 : i32
    %c0_i32_0 = arith.constant 0 : i32
    %c0_i32_1 = arith.constant 0 : i32
    return %c0_i32, %c0_i32_0 : i32, i32
  }
  func.func @transform_3(%arg0: i32) -> (i32, i32) {
    %c0_i32 = arith.constant 0 : i32
    %c0_i32_0 = arith.constant 0 : i32
    %c0_i32_1 = arith.constant 0 : i32
    return %c0_i32, %c0_i32_0 : i32, i32
  }
  func.func @transform_4(%arg0: i32) -> (i32, i32) {
    %c0_i32 = arith.constant 0 : i32
    %c0_i32_0 = arith.constant 0 : i32
    %c0_i32_1 = arith.constant 0 : i32
    return %c0_i32, %c0_i32_0 : i32, i32
  }
  func.func @transform_5(%arg0: i32) -> (i32, i32) {
    %c0_i32 = arith.constant 0 : i32
    %c0_i32_0 = arith.constant 0 : i32
    return %arg0, %c0_i32 : i32, i32
  }
}

</mosaic_0001>

<bundles_post_ra>
// kernel: tpu_custom_call.1
= control target key start
LH: loop header
LB: loop body
LE: loop exit
PB: predicated region body
PF: predicated region fallthrough
CT: control target
= control target key end

     0   :  { %10 = vsyncpa [#allocation3], 0  ;;  %s882_s0 = inlined_call_operand.vmem [shape: f32[16,32], index: 0, kind: input, shape index: {}]   ;;  %s883_s1 = inlined_call_operand.vmem [shape: f32[32,128], index: 1, kind: input, shape index: {}]   ;;  %s884_s2 = inlined_call_operand.vmem [shape: f32[1,128], index: 2, kind: input, shape index: {}]   ;;  %s885_s3 = inlined_call_operand.vmem [shape: f32[128,32], index: 3, kind: input, shape index: {}]   ;;  %s886_s4 = inlined_call_operand.vmem [shape: f32[1,32], index: 4, kind: input, shape index: {}]   ;;  %s887_s5 = inlined_call_operand.hbm [shape: f32[16,32], index: 5, kind: output, shape index: {}]  }
   0x1   :  { %12 = vsyncpa [#allocation3 + $0x1], 0  ;;  %s697_s18 = smov 0   ;;  %s699_s19 = smov 0  }
   0x2   :  { %s701_s20 = smov 0   ;;  %s703_s21 = smov 0  }
   0x3 LB: > { %s718_s22 = sadd.s32 4294967295, %s662_s21   ;;  %s478_s23 = sadd.s32 4294967294, %s662_s21   ;;  %s662_s21 = sphi %s703_s21, %s893_s21   ;;  %s658_s20 = sphi %s701_s20, %s892_s20   ;;  %s654_s19 = sphi %s699_s19, %s891_s19   ;;  %s650_s18 = sphi %s697_s18, %s890_s18  }
   0x4   : > { %s722_s24 = sadd.s32 1, %s662_s21   ;;  %s135_s25 = sadd.s32 1, %s658_s20 }
   0x5   : > { %s132_s26 = ssub.s32 %s662_s21, %s722_s24  ;;  %p145_p0 = scmp.ne.s32.totalorder %s658_s20, %s654_s19 }
   0x6   : > { %p133_p1 = scmp.eq.s32.totalorder %s132_s26, 0  ;;  %p146_p2 = scmp.eq.s32.totalorder %s718_s22, 1 }
   0x7   : > { %p151_p3 = scmp.ne.s32.totalorder %s654_s19, %s650_s18  ;;  %p152_p4 = scmp.eq.s32.totalorder %s478_s23, 1 }
   0x8   : > { %s733_s27 = scalar_select %p133_p1, %s658_s20, %s135_s25  }
   0x9   : > { %p735_p5 = por %p146_p2, %p145_p0  ;;  %p739_p6 = por %p152_p4, %p151_p3 }
   0xa   : > { %p481_p7 = scmp.ge.s32.totalorder %s662_s21, 1  ;;  %p189_p8 = scmp.lt.s32.totalorder %s662_s21, 3 }
   0xc   : > { %p190_p9 = pnand %p481_p7, %p189_p8 }
   0xd   : > { %p216_p10 = scmp.lt.s32.totalorder (!%p190_p9), %s718_s22, 1  ;;  %s213_s26 = sand.u32 (!%p190_p9), 1, %s654_s19  }
   0xe   : > { %193 = sbr.rel (%p190_p9) target bundleno = 451 (0x1c3), region = 40  ;;  %s482_s30 = sshll.u32 (!%p190_p9), %s213_s26, 3 }
   0xf   : > { %s488_s8 = sshll.u32 (!%p190_p9), %s718_s22, 7  ;;  %s215_s9 = scalar_lea.vmem (!%p190_p9), [#allocation2], %s482_s30 }
  0x10   : > { %s419_s10 = sshll.u32 (!%p190_p9), %s215_s9, 4  ;;  %s846_s13 = scalar_lea.hbm (!%p190_p9), %s887_s5, %s488_s8  ;;  %s420_s10 = int_to_ptr.vmem [resolvable:$true] %s419_s10 }
  0x11   : > { %s406_s14 = scalar_lea.sflag (!%p190_p9), [#allocation3], %s213_s26  ;;  %s602_s15 = scalar_lea.vmem (!%p190_p9), %s420_s10, 128 }
  0x12   : > { %p603_p11 = scmp.ne.s32.totalorder (!%p190_p9), %s420_s10, %s602_s15 }
  0x13   : > { %v224_v0 = vld [vmem:[%s883_s1 + $0x18] sm:$0xff]  ;;  %v664_v1 = vmov 0.0   ;;  %v223_v2 = vld [vmem:[%s883_s1 + $0x10] sm:$0xff]  ;;  %vm665_vm0 = vmmov 0   ;;  %s217_s11 = scalar_select %p216_p10, %s718_s22, 1  ;;  %v222_v5 = vld [vmem:[%s883_s1 + $0x8] sm:$0xff] }
  0x14   : > { %513 = vmatprep.subr.mxu0 %v664_v1  ;;  %521 = vmatprep.mubr.msk.f32.mxu0 %vm665_vm0, %v664_v1  ;;  %v326_v3 = vld [vmem:[%s885_s3 + $0x78] sm:$0xff]  ;;  %v325_v4 = vld [vmem:[%s885_s3 + $0x70] sm:$0xff]  ;;  %v324_v6 = vld [vmem:[%s885_s3 + $0x68] sm:$0xff]  ;;  %vm232_vm1 = vcmask 261120   ;;  %p604_p12 = pnand %p603_p11, %p735_p5  ;;  %s666_s22 = smov [#allocation2]  }
  0x15   : > { %514 = vmatpush3.msra.mxu0 %v224_v0  ;;  %524 = vmatprep.subr.mxu1 %v664_v1  ;;  %s483_s16 = sshll.u32 %s217_s11, 3  ;;  %v221_v7 = vld [vmem:[%s883_s1] sm:$0xff]  ;;  %v322_v10 = vld [vmem:[%s885_s3 + $0x58] sm:$0xff]  ;;  %v321_v11 = vld [vmem:[%s885_s3 + $0x50] sm:$0xff] }
  0x16   : > { %515 = vmatprep.subr.mxu0 %v664_v1  ;;  %525 = vmatpush3.msra.mxu1 %v326_v3  ;;  %s219_s7 = scalar_lea.vmem %s882_s0, %s483_s16  ;;  %v323_v9 = vld [vmem:[%s885_s3 + $0x60] sm:$0xff]  ;;  %v320_v12 = vld [vmem:[%s885_s3 + $0x48] sm:$0xff]  ;;  %v318_v14 = vld [vmem:[%s885_s3 + $0x38] sm:$0xff]  ;;  %p605_p13 = pneg %p604_p12 }
  0x17   : > { %516 = vmatpush3.msra.mxu0 %v223_v2  ;;  %526 = vmatprep.subr.mxu1 %v664_v1  ;;  %v220_v8 = vld [vmem:[%s219_s7] sm:$0xff]  ;;  %v317_v15 = vld [vmem:[%s885_s3 + $0x30] sm:$0xff]  ;;  %v316_v16 = vld [vmem:[%s885_s3 + $0x28] sm:$0xff]  ;;  %s606_s16 = sshll.u32 %s666_s22, 4  ;;  %s607_s16 = int_to_ptr.vmem [resolvable:$false] %s606_s16 }
  0x18   : > { %517 = vmatprep.subr.mxu0 %v664_v1  ;;  %527 = vmatpush3.msra.mxu1 %v325_v4  ;;  %v319_v13 = vld [vmem:[%s885_s3 + $0x40] sm:$0xff]  ;;  %v314_v18 = vld [vmem:[%s885_s3 + $0x18] sm:$0xff]  ;;  %v313_v19 = vld [vmem:[%s885_s3 + $0x10] sm:$0xff]  ;;  %s608_s17 = scalar_lea.vmem %s607_s16, 256  ;;  %p609_p0 = scmp.lt.s32.totalorder %s420_s10, %s607_s16 }
  0x19   : > { %518 = vmatpush3.msra.mxu0 %v222_v5  ;;  %528 = vmatprep.subr.mxu1 %v664_v1  ;;  %v315_v17 = vld [vmem:[%s885_s3 + $0x20] sm:$0xff]  ;;  %v312_v20 = vld [vmem:[%s885_s3 + $0x8] sm:$0xff]  ;;  %p610_p1 = scmp.lt.s32.totalorder %s608_s17, %s602_s15 }
  0x1a   : > { %519 = vmatprep.subr.mxu0 %v664_v1  ;;  %529 = vmatpush3.msra.mxu1 %v324_v6  ;;  %v311_v21 = vld [vmem:[%s885_s3] sm:$0xff] }
  0x1b   : > { %520 = vmatpush3.msra.mxu0 %v221_v7  ;;  %530 = vmatprep.subr.mxu1 %v664_v1  ;;  %v484_v22 = vld [vmem:[%s884_s2] ss:$0 sm:$0xff]  ;;  %p611_p2 = por %p610_p1, %p609_p0 }
  0x1c   : > { %522 = vmatmul.mubr.msk.f32.vlgmr.msra.gmra.mxu0 %vm232_vm1, %v220_v8  ;;  %531 = vmatpush3.msra.mxu1 %v323_v9  ;;  %v486_v31 = vld [vmem:[%s886_s4] ss:$0 sm:$0xff] }
  0x1d   : > { %532 = vmatprep.subr.mxu1 %v664_v1  ;;  %556 = vmatprep.mubr.msk.f32.mxu1 %vm665_vm0, %v664_v1  ;;  %p612_p3 = pnand %p611_p2, %p605_p13 }
  0x1e   : > { %533 = vmatpush3.msra.mxu1 %v322_v10 }
  0x1f   : > { %534 = vmatprep.subr.mxu1 %v664_v1 }
  0x20   : > { %535 = vmatpush3.msra.mxu1 %v321_v11 }
  0x21   : > { %536 = vmatprep.subr.mxu1 %v664_v1 }
  0x22   : > { %537 = vmatpush3.msra.mxu1 %v320_v12 }
  0x23   : > { %538 = vmatprep.subr.mxu1 %v664_v1 }
  0x24   : > { %539 = vmatpush3.msra.mxu1 %v319_v13 }
  0x25   : > { %540 = vmatprep.subr.mxu1 %v664_v1 }
  0x26   : > { %541 = vmatpush3.msra.mxu1 %v318_v14 }
  0x27   : > { %542 = vmatprep.subr.mxu1 %v664_v1 }
  0x28   : > { %543 = vmatpush3.msra.mxu1 %v317_v15 }
  0x29   : > { %544 = vmatprep.subr.mxu1 %v664_v1 }
  0x2a   : > { %545 = vmatpush3.msra.mxu1 %v316_v16 }
  0x2b   : > { %546 = vmatprep.subr.mxu1 %v664_v1 }
  0x2c   : > { %547 = vmatpush3.msra.mxu1 %v315_v17 }
  0x2d   : > { %548 = vmatprep.subr.mxu1 %v664_v1 }
  0x2e   : > { %549 = vmatpush3.msra.mxu1 %v314_v18 }
  0x2f   : > { %550 = vmatprep.subr.mxu1 %v664_v1 }
  0x30   : > { %551 = vmatpush3.msra.mxu1 %v313_v19 }
  0x31   : > { %552 = vmatprep.subr.mxu1 %v664_v1 }
  0x32   : > { %553 = vmatpush3.msra.mxu1 %v312_v20 }
  0x33   : > { %554 = vmatprep.subr.mxu1 %v664_v1 }
  0x34   : > { %555 = vmatpush3.msra.mxu1 %v311_v21 }
  0xdc   : > { %v302_v23 = vpop.f32.mrf.mxu0 }
  0xdd   : > { %v303_v24 = vadd.f32 %v484_v22, %v302_v23 }
  0xde   : > { %v523_v25 = vpop.f32.mrf.mxu0 }
  0xdf   : > { %v307_v26 = vmul.f32 0.70710677, %v303_v24  ;;  %v306_v28 = vmul.f32 0.5, %v303_v24 }
  0xe1   : > { %600 = verf.f32 %v307_v26 }
  0xee   : > { %v601_v27 = vpop.eup %600 }
  0xef   : > { %v309_v29 = vadd.f32 1.0, %v601_v27 }
  0xf1   : > { %v310_v30 = vmul.f32 %v309_v29, %v306_v28 }
  0xf3   : > { %557 = vmatmul.mubr.f32.vlgmr.msra.gmra.mxu1 %v310_v30 }
 0x1b3   : > { %v400_v32 = vpop.f32.mrf.mxu1 }
 0x1b4   : > { %v401_v33 = vadd.f32 %v486_v31, %v400_v32 }
 0x1b5   : > { %v558_v34 = vpop.f32.mrf.mxu1 }
 0x1b6   : > { %404 = vst.msk [vmem:[%s215_s9] sm:$0xff] %vm232_vm1, %v401_v33 }
 0x1b7   : > { %615 = shalt.err (!%p612_p3)
}
 0x1b8   : > { %s616_s23 = scalar_lea.hbm %s846_s13, 128  ;;  %s620_s30 = scalar_lea.hbm %s887_s5, 256 }
 0x1b9   : > { %p617_p4 = scmp.ne.s32.totalorder %s846_s13, %s616_s23  ;;  %p621_p9 = scmp.lt.s32.totalorder %s846_s13, %s887_s5 }
 0x1ba   : > { %p622_p10 = scmp.lt.s32.totalorder %s620_s30, %s616_s23 }
 0x1bb   : > { %p618_p7 = pnand %p617_p4, %p735_p5 }
 0x1bc   : > { %p623_p11 = por %p622_p10, %p621_p9 }
 0x1bd   : > { %p619_p8 = pneg %p618_p7 }
 0x1bf   : > { %p624_p12 = pnand %p623_p11, %p619_p8 }
 0x1c1   : > { %627 = shalt.err (!%p624_p12)
}
 0x1c2   : > { %559 = dma.vmem_to_hbm [thread:$0]  (%p735_p5), %s420_s10, 128, %s846_s13, %s406_s14  }
 0x1c3 PF: > { %p565_p13 = scmp.ge.s32.totalorder %s662_s21, 2  ;;  %s431_s8 = sand.u32 1, %s650_s18  }
 0x1c4   : > { %s432_s9 = scalar_lea.sflag [#allocation3], %s431_s8 }
 0x1c5   : > { %p562_p0 = pnand %p565_p13, %p739_p6 }
 0x1c7   : > { %p563_p1 = pneg %p562_p0 }
 0x1c9   : > { %645 = dma.done.wait (%p563_p1), %s432_s9, 128  }
 0x1ca   : > { %647 = vsyncadd (%p563_p1), %s432_s9, 4294967168  ;;  %p15_p2 = scmp.ge.s32.totalorder %s722_s24, 4   ;;  %s890_s18 = smov %s654_s19 }
 0x1cb   : > { %s891_s19 = smov %s658_s20  ;;  %s892_s20 = smov %s733_s27 }
 0x1cc   : > { %s893_s21 = smov %s722_s24  ;;  %17 = sbr.rel (!%p15_p2) target bundleno = 3 (0x3), region = 75 }
 0x1d1   :  { %437 = vsyncpa [#allocation3], 1 }
 0x1d2   :  { %439 = vsyncpa [#allocation3 + $0x1], 1 }

</bundles_post_ra>
